<compile_context>
chip_gen: v5e
topology: v5e:2x2
jax: 0.10.0
libtpu: 0.0.40
codegen_flags: <defaults>
</compile_context>

<pallas_src>
import functools

import jax
import jax.numpy as jnp
from jax.experimental import pallas as pl
from jax.experimental.pallas import tpu as pltpu

_MIB = 1024 * 1024


def _round_up(x: int, m: int) -> int:
    return (x + m - 1) // m * m


def _round_down(x: int, m: int) -> int:
    return (x // m) * m


def _vmem_limit_bytes() -> int:
    """Generation-aware scoped-VMEM request (v7x only has 64 MiB physical)."""
    cap = 64 * _MIB
    try:
        cap = int(getattr(pltpu.get_tpu_info(), "vmem_capacity_bytes", cap))
    except Exception:
        pass
    return max(32 * _MIB, min((cap * 3) // 4, 96 * _MIB))


def _pick_rows(n_rows, row_bytes, vmem_limit, cap, override):
    """Pick a batch-row tile (multiple of 8 whenever it is a partial block)."""
    if override is not None:
        rows = max(8, _round_down(int(override), 8))
    else:
        budget = int(vmem_limit * 0.6)
        rows = max(8, min(_round_down(budget // row_bytes, 8), cap))
    if rows >= n_rows:
        if n_rows % 8 == 0 or n_rows <= 8:
            return n_rows, 1              # single full-extent block (always legal)
        rows = _round_down(n_rows, 8)
    return rows, pl.cdiv(n_rows, rows)


def _acc_rows(acc_ref, v):
    """acc (8,128) += per-lane row-sum of v (TM,128), using plain vreg adds."""
    tm = v.shape[0]
    if tm % 8 == 0:
        acc_ref[...] += jnp.sum(v.reshape(tm // 8, 8, 128), axis=0)
    else:  # tiny full-extent block (TM < 8)
        acc_ref[0:1, :] = acc_ref[0:1, :] + jnp.sum(v, axis=0, keepdims=True)


# ---------------------------------------------------------------------------
# Lane-packed path: C | 128, logits viewed as (R, 128) with G = 128/C batch
# rows per vreg row.  One HBM pass, MXU does the segmented softmax sums.
# ---------------------------------------------------------------------------
def _dice_kernel_packed(x_ref, t_ref, bmat_ref, emat_ref,
                        inter_out, sump_out, inter_acc, sump_acc,
                        *, n_rows, block_rows, c, needs_mask):
    j = pl.program_id(1)

    @pl.when(j == 0)
    def _init():
        inter_acc[...] = jnp.zeros_like(inter_acc)
        sump_acc[...] = jnp.zeros_like(sump_acc)

    chunk = pl.program_id(0) * pl.num_programs(1) + j
    row0 = chunk * block_rows

    x = x_ref[...].astype(jnp.float32)     # (TM, 128): G batch rows per vreg row
    t = t_ref[...]                         # (TM, G) int32 class ids
    bmat = bmat_ref[...]                   # (128, 128) block-diagonal ones
    emat = emat_ref[...]                   # (G, 128) group-expansion ones
    tm = x.shape[0]

    lane = jax.lax.broadcasted_iota(jnp.int32, (1, 128), 1)
    clsm = (lane % c).astype(jnp.float32)  # class id carried by each lane

    def accumulate(xv, valid):
        # NOTE: subtracting the per-packed-row max (same constant for every
        # group in that row) leaves each group's softmax unchanged and keeps
        # exp() from overflowing.  An exact per-group max (log2(C) pltpu.roll
        # steps) is only needed for >~80 logit spread within one vreg row.
        m = jnp.max(xv, axis=1, keepdims=True)                       # (TM, 1)
        e = jnp.exp(xv - m)
        denom = jnp.dot(e, bmat, preferred_element_type=jnp.float32,
                        precision=jax.lax.Precision.HIGHEST)         # seg. sum, bcast
        p = e * pl.reciprocal(jnp.maximum(denom, 1e-30), approx=False)
        texp = jnp.dot(t.astype(jnp.float32), emat,
                       preferred_element_type=jnp.float32)           # target id per lane
        if valid is not None:
            p = jnp.where(valid, p, 0.0)
        inter = jnp.where(clsm == texp, p, 0.0)
        _acc_rows(sump_acc, p)
        _acc_rows(inter_acc, inter)

    if not needs_mask:                      # trace-time: every tile is full
        accumulate(x, None)
    else:
        full = (row0 + block_rows) <= n_rows

        @pl.when(full)
        def _fast():
            accumulate(x, None)

        @pl.when(jnp.logical_not(full))
        def _tail():
            row = jax.lax.broadcasted_iota(jnp.int32, (tm, 1), 0)
            valid = (row0 + row) < n_rows
            accumulate(jnp.where(valid, x, 0.0), valid)

    @pl.when(j == pl.num_programs(1) - 1)
    def _flush():
        inter_out[0] = inter_acc[...]
        sump_out[0] = sump_acc[...]


def _dice_sums_packed(inputs, targets, block_rows, num_shards, vmem_limit):
    n, c = inputs.shape
    g = 128 // c
    r = (n * c) // 128
    xr = inputs.reshape(r, 128)            # free row-major reshape (no HBM copy)
    tr = targets.reshape(r, g)

    isz = inputs.dtype.itemsize
    row_bytes = 2 * 128 * isz + 2 * 128 * 4 + 5 * 128 * 4
    tm, num_chunks = _pick_rows(r, row_bytes, vmem_limit, 32768, block_rows)
    num_shards = max(1, min(int(num_shards), num_chunks))
    cps = pl.cdiv(num_chunks, num_shards)
    needs_mask = (num_shards * cps * tm) != r

    lane = jnp.arange(128)
    bmat = (lane[:, None] // c == lane[None, :] // c).astype(jnp.float32)
    emat = (jnp.arange(g)[:, None] == (lane[None, :] // c)).astype(jnp.float32)

    def in_index(s, j):
        # Clamp so DMAs always start in-bounds; overhang chunks contribute 0.
        return (jnp.minimum(s * cps + j, num_chunks - 1), 0)

    kernel = functools.partial(_dice_kernel_packed, n_rows=r, block_rows=tm,
                               c=c, needs_mask=needs_mask)
    o_inter, o_sump = pl.pallas_call(
        kernel,
        out_shape=(jax.ShapeDtypeStruct((num_shards, 8, 128), jnp.float32),
                   jax.ShapeDtypeStruct((num_shards, 8, 128), jnp.float32)),
        grid_spec=pltpu.PrefetchScalarGridSpec(
            num_scalar_prefetch=0,
            grid=(num_shards, cps),
            in_specs=[
                pl.BlockSpec((tm, 128), in_index),
                pl.BlockSpec((tm, g), in_index),
                pl.BlockSpec((128, 128), lambda s, j: (0, 0)),
                pl.BlockSpec((g, 128), lambda s, j: (0, 0)),
            ],
            out_specs=[
                pl.BlockSpec((1, 8, 128), lambda s, j: (s, 0, 0)),
                pl.BlockSpec((1, 8, 128), lambda s, j: (s, 0, 0)),
            ],
            scratch_shapes=[pltpu.VMEM((8, 128), jnp.float32),
                            pltpu.VMEM((8, 128), jnp.float32)]),
        compiler_params=pltpu.CompilerParams(
            dimension_semantics=("parallel", "arbitrary"),
            vmem_limit_bytes=vmem_limit),
    )(xr, tr, bmat, emat)

    lane_inter = jnp.sum(o_inter, axis=(0, 1))          # (128,)
    lane_sump = jnp.sum(o_sump, axis=(0, 1))
    inter = jnp.sum(lane_inter.reshape(g, c), axis=0)   # fold lane -> class
    sump = jnp.sum(lane_sump.reshape(g, c), axis=0)
    return inter, sump


# ---------------------------------------------------------------------------
# Native (N, C) path: softmax over lanes, cross-row reduce via ones-row MXU
# matmuls.  Used for C >= 32 and for small C that cannot use the packed view.
# ---------------------------------------------------------------------------
def _dice_kernel_nc(x_ref, t_ref, inter_out, sump_out, inter_acc, sump_acc,
                    *, n_rows, block_rows, needs_mask):
    j = pl.program_id(1)

    @pl.when(j == 0)
    def _init():
        inter_acc[...] = jnp.zeros_like(inter_acc)
        sump_acc[...] = jnp.zeros_like(sump_acc)

    chunk = pl.program_id(0) * pl.num_programs(1) + j
    row0 = chunk * block_rows

    x = x_ref[...].astype(jnp.float32)     # (TM, C)
    t = t_ref[...]                         # (TM, 1) int32
    tm, c = x.shape
    cls = jax.lax.broadcasted_iota(jnp.int32, (1, c), 1)
    ones_row = jnp.ones((1, tm), jnp.float32)

    def accumulate(xv, valid):
        m = jnp.max(xv, axis=1, keepdims=True)
        e = jnp.exp(xv - m)
        p = e * pl.reciprocal(jnp.sum(e, axis=1, keepdims=True), approx=False)
        if valid is not None:
            p = jnp.where(valid, p, 0.0)
        inter = jnp.where(cls == t, p, 0.0)      # no one-hot materialization
        sump_acc[...] += jnp.dot(ones_row, p, preferred_element_type=jnp.float32,
                                 precision=jax.lax.Precision.HIGHEST)
        inter_acc[...] += jnp.dot(ones_row, inter, preferred_element_type=jnp.float32,
                                  precision=jax.lax.Precision.HIGHEST)

    if not needs_mask:
        accumulate(x, None)
    else:
        full = (row0 + block_rows) <= n_rows

        @pl.when(full)
        def _fast():
            accumulate(x, None)

        @pl.when(jnp.logical_not(full))
        def _tail():
            row = jax.lax.broadcasted_iota(jnp.int32, (tm, 1), 0)
            valid = (row0 + row) < n_rows
            accumulate(jnp.where(valid, x, 0.0), valid)

    @pl.when(j == pl.num_programs(1) - 1)
    def _flush():
        inter_out[0] = inter_acc[...]
        sump_out[0] = sump_acc[...]


def _dice_sums_nc(inputs, targets, block_rows, num_shards, vmem_limit):
    n, c = inputs.shape
    t2d = targets.reshape(n, 1)

    isz = inputs.dtype.itemsize
    cpad = _round_up(max(c, 1), 128)
    row_bytes = 2 * cpad * isz + 2 * 128 * 4 + 4 * cpad * 4
    tm, num_chunks = _pick_rows(n, row_bytes, vmem_limit, 16384, block_rows)
    num_shards = max(1, min(int(num_shards), num_chunks))
    cps = pl.cdiv(num_chunks, num_shards)
    needs_mask = (num_shards * cps * tm) != n

    def in_index(s, j):
        return (jnp.minimum(s * cps + j, num_chunks - 1), 0)

    kernel = functools.partial(_dice_kernel_nc, n_rows=n, block_rows=tm,
                               needs_mask=needs_mask)
    o_inter, o_sump = pl.pallas_call(
        kernel,
        out_shape=(jax.ShapeDtypeStruct((num_shards, 1, c), jnp.float32),
                   jax.ShapeDtypeStruct((num_shards, 1, c), jnp.float32)),
        grid_spec=pltpu.PrefetchScalarGridSpec(
            num_scalar_prefetch=0,
            grid=(num_shards, cps),
            in_specs=[
                pl.BlockSpec((tm, c), in_index),
                pl.BlockSpec((tm, 1), in_index),
            ],
            out_specs=[
                pl.BlockSpec((1, 1, c), lambda s, j: (s, 0, 0)),
                pl.BlockSpec((1, 1, c), lambda s, j: (s, 0, 0)),
            ],
            scratch_shapes=[pltpu.VMEM((1, c), jnp.float32),
                            pltpu.VMEM((1, c), jnp.float32)]),
        compiler_params=pltpu.CompilerParams(
            dimension_semantics=("parallel", "arbitrary"),
            vmem_limit_bytes=vmem_limit),
    )(inputs, t2d)

    inter = jnp.sum(o_inter[:, 0, :], axis=0)
    sump = jnp.sum(o_sump[:, 0, :], axis=0)
    return inter, sump


def dice_loss(inputs: jax.Array, targets: jax.Array, smooth: float = 1e-6,
              *, block_rows=None, num_shards: int = 1) -> jax.Array:
    """Pallas TPU DiceLoss.forward.

    inputs    : (N, C) logits (float32 or bfloat16, streamed as given).
    targets   : (N,) integer class ids in [0, C).
    block_rows: optional batch-tile override (testing / tuning knob).
    num_shards: leading "parallel" grid axis; keep 1 on v5e/v6e, try 2 on v7x.
    """
    n, c = inputs.shape
    targets = targets.astype(jnp.int32)
    vmem_limit = _vmem_limit_bytes()

    # sum_n onehot == per-class target count: one pass over N int32s in JAX.
    counts = jnp.zeros((c,), jnp.float32).at[targets].add(1.0)

    if c < 32 and 128 % c == 0 and (n * c) % 128 == 0:
        inter, sump = _dice_sums_packed(inputs, targets, block_rows,
                                        num_shards, vmem_limit)
    else:
        # NOTE: small C that cannot use the packed view pads the class axis to
        # 128 lanes (VALU waste) but still streams the logits exactly once.
        inter, sump = _dice_sums_nc(inputs, targets, block_rows,
                                    num_shards, vmem_limit)

    union = sump + counts
    dice = (2.0 * inter + smooth) / (union + smooth)
    return 1.0 - jnp.mean(dice)


def _reference(x, t, smooth=1e-6):
    p = jax.nn.softmax(x.astype(jnp.float32), axis=1)
    oh = jax.nn.one_hot(t, x.shape[1], dtype=jnp.float32)
    inter = jnp.sum(p * oh, axis=0)
    union = jnp.sum(p, axis=0) + jnp.sum(oh, axis=0)
    return 1.0 - jnp.mean((2.0 * inter + smooth) / (union + smooth))


if __name__ == "__main__":
    key = jax.random.PRNGKey(0)
    ks = jax.random.split(key, 8)

    def check(name, x, t, **kw):
        loss = dice_loss(x, t, **kw)
        jax.block_until_ready(loss)
        ref = _reference(x, t)
        assert jnp.allclose(loss, ref, rtol=2e-3, atol=1e-3), (name, loss, ref)

    # 1) Tiny class count -> lane-packed path (C | 128, N % (128/C) == 0).
    #    R = 10 packed rows with block_rows=8 -> 2 chunks + ragged-tail mask.
    n, c = 320, 4
    check("packed-c4",
          jax.random.normal(ks[0], (n, c), jnp.float32),
          jax.random.randint(ks[1], (n,), 0, c, jnp.int32),
          block_rows=8)

    # 2) Tiny class count that cannot pack (N not a multiple of 32) -> NC path.
    n, c = 300, 4
    check("nc-smallC",
          jax.random.normal(ks[2], (n, c), jnp.float32),
          jax.random.randint(ks[3], (n,), 0, c, jnp.int32),
          block_rows=128)

    # 3) Wide class axis, ragged batch, 2-shard grid (exercises overhang chunk).
    n, c = 300, 128
    check("nc-c128",
          jax.random.normal(ks[4], (n, c), jnp.float32),
          jax.random.randint(ks[5], (n,), 0, c, jnp.int32),
          block_rows=64, num_shards=2)

    # 4) Moderate C (>= 32 threshold), bf16 logits, exact-multiple batch
    #    (exercises the trace-time unmasked fast path).
    n, c = 256, 48
    check("nc-c48-bf16",
          jax.random.normal(ks[6], (n, c), jnp.float32).astype(jnp.bfloat16),
          jax.random.randint(ks[7], (n,), 0, c, jnp.int32),
          block_rows=64)

    print("KERNEL_OK")
</pallas_src>

<mosaic_0001>
module attributes {stable_mosaic.version = 11 : i64} {
  func.func @_dice_kernel_packed(%arg0: i32, %arg1: i32, %arg2: memref<8x128xf32, #tpu.memory_space<vmem>>, %arg3: memref<8x32xi32, #tpu.memory_space<vmem>>, %arg4: memref<128x128xf32, #tpu.memory_space<vmem>>, %arg5: memref<32x128xf32, #tpu.memory_space<vmem>>, %arg6: memref<1x8x128xf32, #tpu.memory_space<vmem>>, %arg7: memref<1x8x128xf32, #tpu.memory_space<vmem>>, %arg8: memref<8x128xf32, #tpu.memory_space<vmem>>, %arg9: memref<8x128xf32, #tpu.memory_space<vmem>>) attributes {dimension_semantics = [#tpu.dimension_semantics<parallel>, #tpu.dimension_semantics<arbitrary>], iteration_bounds = array<i64: 1, 2>, scalar_prefetch = 0 : i64, scratch_operands = 2 : i64, tpu.core_type = #tpu.core_type<tc>, window_params = [{transform_indices = @transform_0, window_bounds = array<i64: 8, 128>}, {transform_indices = @transform_1, window_bounds = array<i64: 8, 32>}, {pipeline_mode = #tpu.pipeline_mode<synchronous>, transform_indices = @transform_2, window_bounds = array<i64: 128, 128>}, {pipeline_mode = #tpu.pipeline_mode<synchronous>, transform_indices = @transform_3, window_bounds = array<i64: 32, 128>}, {transform_indices = @transform_4, window_bounds = array<i64: 1, 8, 128>}, {transform_indices = @transform_5, window_bounds = array<i64: 1, 8, 128>}]} {
    %c0_i32 = arith.constant 0 : i32
    %0 = arith.cmpi eq, %arg1, %c0_i32 : i32
    %1 = arith.extui %0 : i1 to i32
    %c0_i32_0 = arith.constant 0 : i32
    %2 = arith.cmpi ne, %1, %c0_i32_0 : i32
    scf.if %2 {
      %cst = arith.constant 0.000000e+00 : f32
      %38 = vector.broadcast %cst : f32 to vector<8x128xf32>
      %c0_17 = arith.constant 0 : index
      %c0_18 = arith.constant 0 : index
      %39 = vector.load %arg8[%c0_17, %c0_18] : memref<8x128xf32, #tpu.memory_space<vmem>>, vector<8x128xf32>
      tpu.vector_store %arg8[%c0_17, %c0_18], %38 {strides = array<i32>} : memref<8x128xf32, #tpu.memory_space<vmem>>, vector<8x128xf32>,
      %cst_19 = arith.constant 0.000000e+00 : f32
      %40 = vector.broadcast %cst_19 : f32 to vector<8x128xf32>
      %c0_20 = arith.constant 0 : index
      %c0_21 = arith.constant 0 : index
      %41 = vector.load %arg9[%c0_20, %c0_21] : memref<8x128xf32, #tpu.memory_space<vmem>>, vector<8x128xf32>
      tpu.vector_store %arg9[%c0_20, %c0_21], %40 {strides = array<i32>} : memref<8x128xf32, #tpu.memory_space<vmem>>, vector<8x128xf32>,
    } else {
    }
    %c2_i32 = arith.constant 2 : i32
    %3 = arith.muli %arg0, %c2_i32 : i32
    %4 = arith.addi %3, %arg1 : i32
    %c8_i32 = arith.constant 8 : i32
    %5 = arith.muli %4, %c8_i32 : i32
    %c0 = arith.constant 0 : index
    %c0_1 = arith.constant 0 : index
    %6 = vector.load %arg2[%c0, %c0_1] : memref<8x128xf32, #tpu.memory_space<vmem>>, vector<8x128xf32>
    %c0_2 = arith.constant 0 : index
    %c0_3 = arith.constant 0 : index
    %7 = vector.load %arg3[%c0_2, %c0_3] : memref<8x32xi32, #tpu.memory_space<vmem>>, vector<8x32xi32>
    %c0_4 = arith.constant 0 : index
    %c0_5 = arith.constant 0 : index
    %8 = vector.load %arg4[%c0_4, %c0_5] : memref<128x128xf32, #tpu.memory_space<vmem>>, vector<128x128xf32>
    %c0_6 = arith.constant 0 : index
    %c0_7 = arith.constant 0 : index
    %9 = vector.load %arg5[%c0_6, %c0_7] : memref<32x128xf32, #tpu.memory_space<vmem>>, vector<32x128xf32>
    %10 = tpu.iota {dimensions = array<i32: 1>} : vector<1x128xi32>
    %c4_i32 = arith.constant 4 : i32
    %c0_i32_8 = arith.constant 0 : i32
    %11 = arith.cmpi eq, %c4_i32, %c0_i32_8 : i32
    %c1_i32 = arith.constant 1 : i32
    %12 = arith.select %11, %c1_i32, %c4_i32 : i32
    %13 = vector.broadcast %12 : i32 to vector<1x128xi32>
    %14 = arith.remsi %10, %13 : vector<1x128xi32>
    %c0_i32_9 = arith.constant 0 : i32
    %15 = vector.broadcast %c0_i32_9 : i32 to vector<1x128xi32>
    %16 = arith.cmpi ne, %14, %15 : vector<1x128xi32>
    %c0_i32_10 = arith.constant 0 : i32
    %17 = vector.broadcast %c0_i32_10 : i32 to vector<1x128xi32>
    %18 = arith.cmpi slt, %14, %17 : vector<1x128xi32>
    %c0_i32_11 = arith.constant 0 : i32
    %19 = arith.cmpi slt, %12, %c0_i32_11 : i32
    %20 = vector.broadcast %19 : i1 to vector<1x128xi1>
    %21 = vector.broadcast %20 : vector<1x128xi1> to vector<1x128xi1>
    %22 = arith.xori %18, %21 : vector<1x128xi1>
    %23 = arith.andi %22, %16 : vector<1x128xi1>
    %24 = vector.broadcast %12 : i32 to vector<1x128xi32>
    %25 = arith.addi %14, %24 : vector<1x128xi32>
    %26 = arith.select %23, %25, %14 : vector<1x128xi1>, vector<1x128xi32>
    %27 = arith.sitofp %26 : vector<1x128xi32> to vector<1x128xf32>
    %c8_i32_12 = arith.constant 8 : i32
    %28 = arith.addi %5, %c8_i32_12 : i32
    %c10_i32 = arith.constant 10 : i32
    %29 = arith.cmpi sle, %28, %c10_i32 : i32
    %30 = arith.extui %29 : i1 to i32
    %c0_i32_13 = arith.constant 0 : i32
    %31 = arith.cmpi ne, %30, %c0_i32_13 : i32
    scf.if %31 {
      %cst = arith.constant dense<0xFF800000> : vector<8xf32>
      %38 = vector.multi_reduction <maximumf>, %6, %cst [1] : vector<8x128xf32> to vector<8xf32>
      %39 = vector.shape_cast %38 : vector<8xf32> to vector<8x1xf32>
      %40 = vector.broadcast %39 : vector<8x1xf32> to vector<8x128xf32>
      %41 = arith.subf %6, %40 : vector<8x128xf32>
      %42 = math.exp %41 : vector<8x128xf32>
      %cst_17 = arith.constant dense<0.000000e+00> : vector<8x128xf32>
      %43 = tpu.matmul %42, %8, %cst_17 {dimension_numbers = #tpu.dot_dimension_numbers<[1], [0], [0], [1], [0, 0, 1, 1], [], []>, precision = #tpu.contract_precision<fp32>} : vector<8x128xf32>, vector<128x128xf32>, vector<8x128xf32> -> vector<8x128xf32>
      %cst_18 = arith.constant 1.000000e-30 : f32
      %44 = vector.broadcast %cst_18 : f32 to vector<8x128xf32>
      %45 = arith.maximumf %43, %44 : vector<8x128xf32>
      %46 = tpu.reciprocal %45 : vector<8x128xf32> -> vector<8x128xf32>
      %47 = arith.mulf %42, %46 : vector<8x128xf32>
      %48 = arith.sitofp %7 : vector<8x32xi32> to vector<8x32xf32>
      %cst_19 = arith.constant dense<0.000000e+00> : vector<8x128xf32>
      %49 = tpu.matmul %48, %9, %cst_19 {dimension_numbers = #tpu.dot_dimension_numbers<[1], [0], [0], [1], [0, 0, 1, 1], [], []>} : vector<8x32xf32>, vector<32x128xf32>, vector<8x128xf32> -> vector<8x128xf32>
      %50 = vector.broadcast %27 : vector<1x128xf32> to vector<8x128xf32>
      %51 = arith.cmpf oeq, %50, %49 : vector<8x128xf32>
      %cst_20 = arith.constant 0.000000e+00 : f32
      %52 = vector.broadcast %cst_20 : f32 to vector<8x128xf32>
      %53 = arith.select %51, %47, %52 : vector<8x128xi1>, vector<8x128xf32>
      %c0_21 = arith.constant 0 : index
      %c0_22 = arith.constant 0 : index
      %54 = vector.load %arg9[%c0_21, %c0_22] : memref<8x128xf32, #tpu.memory_space<vmem>>, vector<8x128xf32>
      %55 = vector.shape_cast %47 : vector<8x128xf32> to vector<1x8x128xf32>
      %cst_23 = arith.constant dense<0.000000e+00> : vector<8x128xf32>
      %56 = vector.multi_reduction <add>, %55, %cst_23 [0] : vector<1x8x128xf32> to vector<8x128xf32>
      %57 = arith.addf %54, %56 : vector<8x128xf32>
      %c0_24 = arith.constant 0 : index
      %c0_25 = arith.constant 0 : index
      %58 = vector.load %arg9[%c0_24, %c0_25] : memref<8x128xf32, #tpu.memory_space<vmem>>, vector<8x128xf32>
      tpu.vector_store %arg9[%c0_24, %c0_25], %57 {strides = array<i32>} : memref<8x128xf32, #tpu.memory_space<vmem>>, vector<8x128xf32>,
      %c0_26 = arith.constant 0 : index
      %c0_27 = arith.constant 0 : index
      %59 = vector.load %arg8[%c0_26, %c0_27] : memref<8x128xf32, #tpu.memory_space<vmem>>, vector<8x128xf32>
      %60 = vector.shape_cast %53 : vector<8x128xf32> to vector<1x8x128xf32>
      %cst_28 = arith.constant dense<0.000000e+00> : vector<8x128xf32>
      %61 = vector.multi_reduction <add>, %60, %cst_28 [0] : vector<1x8x128xf32> to vector<8x128xf32>
      %62 = arith.addf %59, %61 : vector<8x128xf32>
      %c0_29 = arith.constant 0 : index
      %c0_30 = arith.constant 0 : index
      %63 = vector.load %arg8[%c0_29, %c0_30] : memref<8x128xf32, #tpu.memory_space<vmem>>, vector<8x128xf32>
      tpu.vector_store %arg8[%c0_29, %c0_30], %62 {strides = array<i32>} : memref<8x128xf32, #tpu.memory_space<vmem>>, vector<8x128xf32>,
    } else {
    }
    %true = arith.constant true
    %32 = arith.xori %29, %true : i1
    %33 = arith.extui %32 : i1 to i32
    %c0_i32_14 = arith.constant 0 : i32
    %34 = arith.cmpi ne, %33, %c0_i32_14 : i32
    scf.if %34 {
      %38 = tpu.iota {dimensions = array<i32: 0>} : vector<8x1xi32>
      %39 = vector.broadcast %5 : i32 to vector<8x1xi32>
      %40 = arith.addi %39, %38 : vector<8x1xi32>
      %c10_i32_17 = arith.constant 10 : i32
      %41 = vector.broadcast %c10_i32_17 : i32 to vector<8x1xi32>
      %42 = arith.cmpi slt, %40, %41 : vector<8x1xi32>
      %cst = arith.constant 0.000000e+00 : f32
      %43 = vector.shape_cast %42 : vector<8x1xi1> to vector<8x1xi1>
      %44 = vector.broadcast %43 : vector<8x1xi1> to vector<8x128xi1>
      %45 = vector.broadcast %cst : f32 to vector<8x128xf32>
      %46 = arith.select %44, %6, %45 : vector<8x128xi1>, vector<8x128xf32>
      %cst_18 = arith.constant dense<0xFF800000> : vector<8xf32>
      %47 = vector.multi_reduction <maximumf>, %46, %cst_18 [1] : vector<8x128xf32> to vector<8xf32>
      %48 = vector.shape_cast %47 : vector<8xf32> to vector<8x1xf32>
      %49 = vector.broadcast %48 : vector<8x1xf32> to vector<8x128xf32>
      %50 = arith.subf %46, %49 : vector<8x128xf32>
      %51 = math.exp %50 : vector<8x128xf32>
      %cst_19 = arith.constant dense<0.000000e+00> : vector<8x128xf32>
      %52 = tpu.matmul %51, %8, %cst_19 {dimension_numbers = #tpu.dot_dimension_numbers<[1], [0], [0], [1], [0, 0, 1, 1], [], []>, precision = #tpu.contract_precision<fp32>} : vector<8x128xf32>, vector<128x128xf32>, vector<8x128xf32> -> vector<8x128xf32>
      %cst_20 = arith.constant 1.000000e-30 : f32
      %53 = vector.broadcast %cst_20 : f32 to vector<8x128xf32>
      %54 = arith.maximumf %52, %53 : vector<8x128xf32>
      %55 = tpu.reciprocal %54 : vector<8x128xf32> -> vector<8x128xf32>
      %56 = arith.mulf %51, %55 : vector<8x128xf32>
      %57 = arith.sitofp %7 : vector<8x32xi32> to vector<8x32xf32>
      %cst_21 = arith.constant dense<0.000000e+00> : vector<8x128xf32>
      %58 = tpu.matmul %57, %9, %cst_21 {dimension_numbers = #tpu.dot_dimension_numbers<[1], [0], [0], [1], [0, 0, 1, 1], [], []>} : vector<8x32xf32>, vector<32x128xf32>, vector<8x128xf32> -> vector<8x128xf32>
      %cst_22 = arith.constant 0.000000e+00 : f32
      %59 = vector.shape_cast %42 : vector<8x1xi1> to vector<8x1xi1>
      %60 = vector.broadcast %59 : vector<8x1xi1> to vector<8x128xi1>
      %61 = vector.broadcast %cst_22 : f32 to vector<8x128xf32>
      %62 = arith.select %60, %56, %61 : vector<8x128xi1>, vector<8x128xf32>
      %63 = vector.broadcast %27 : vector<1x128xf32> to vector<8x128xf32>
      %64 = arith.cmpf oeq, %63, %58 : vector<8x128xf32>
      %cst_23 = arith.constant 0.000000e+00 : f32
      %65 = vector.broadcast %cst_23 : f32 to vector<8x128xf32>
      %66 = arith.select %64, %62, %65 : vector<8x128xi1>, vector<8x128xf32>
      %c0_24 = arith.constant 0 : index
      %c0_25 = arith.constant 0 : index
      %67 = vector.load %arg9[%c0_24, %c0_25] : memref<8x128xf32, #tpu.memory_space<vmem>>, vector<8x128xf32>
      %68 = vector.shape_cast %62 : vector<8x128xf32> to vector<1x8x128xf32>
      %cst_26 = arith.constant dense<0.000000e+00> : vector<8x128xf32>
      %69 = vector.multi_reduction <add>, %68, %cst_26 [0] : vector<1x8x128xf32> to vector<8x128xf32>
      %70 = arith.addf %67, %69 : vector<8x128xf32>
      %c0_27 = arith.constant 0 : index
      %c0_28 = arith.constant 0 : index
      %71 = vector.load %arg9[%c0_27, %c0_28] : memref<8x128xf32, #tpu.memory_space<vmem>>, vector<8x128xf32>
      tpu.vector_store %arg9[%c0_27, %c0_28], %70 {strides = array<i32>} : memref<8x128xf32, #tpu.memory_space<vmem>>, vector<8x128xf32>,
      %c0_29 = arith.constant 0 : index
      %c0_30 = arith.constant 0 : index
      %72 = vector.load %arg8[%c0_29, %c0_30] : memref<8x128xf32, #tpu.memory_space<vmem>>, vector<8x128xf32>
      %73 = vector.shape_cast %66 : vector<8x128xf32> to vector<1x8x128xf32>
      %cst_31 = arith.constant dense<0.000000e+00> : vector<8x128xf32>
      %74 = vector.multi_reduction <add>, %73, %cst_31 [0] : vector<1x8x128xf32> to vector<8x128xf32>
      %75 = arith.addf %72, %74 : vector<8x128xf32>
      %c0_32 = arith.constant 0 : index
      %c0_33 = arith.constant 0 : index
      %76 = vector.load %arg8[%c0_32, %c0_33] : memref<8x128xf32, #tpu.memory_space<vmem>>, vector<8x128xf32>
      tpu.vector_store %arg8[%c0_32, %c0_33], %75 {strides = array<i32>} : memref<8x128xf32, #tpu.memory_space<vmem>>, vector<8x128xf32>,
    } else {
    }
    %c1_i32_15 = arith.constant 1 : i32
    %35 = arith.cmpi eq, %arg1, %c1_i32_15 : i32
    %36 = arith.extui %35 : i1 to i32
    %c0_i32_16 = arith.constant 0 : i32
    %37 = arith.cmpi ne, %36, %c0_i32_16 : i32
    scf.if %37 {
      %c0_17 = arith.constant 0 : index
      %c0_18 = arith.constant 0 : index
      %38 = vector.load %arg8[%c0_17, %c0_18] : memref<8x128xf32, #tpu.memory_space<vmem>>, vector<8x128xf32>
      %c0_19 = arith.constant 0 : index
      %c0_20 = arith.constant 0 : index
      %c0_21 = arith.constant 0 : index
      %39 = vector.load %arg6[%c0_19, %c0_20, %c0_21] : memref<1x8x128xf32, #tpu.memory_space<vmem>>, vector<1x8x128xf32>
      %40 = vector.shape_cast %39 : vector<1x8x128xf32> to vector<8x128xf32>
      %41 = vector.shape_cast %38 : vector<8x128xf32> to vector<1x8x128xf32>
      tpu.vector_store %arg6[%c0_19, %c0_20, %c0_21], %41 {strides = array<i32>} : memref<1x8x128xf32, #tpu.memory_space<vmem>>, vector<1x8x128xf32>,
      %c0_22 = arith.constant 0 : index
      %c0_23 = arith.constant 0 : index
      %42 = vector.load %arg9[%c0_22, %c0_23] : memref<8x128xf32, #tpu.memory_space<vmem>>, vector<8x128xf32>
      %c0_24 = arith.constant 0 : index
      %c0_25 = arith.constant 0 : index
      %c0_26 = arith.constant 0 : index
      %43 = vector.load %arg7[%c0_24, %c0_25, %c0_26] : memref<1x8x128xf32, #tpu.memory_space<vmem>>, vector<1x8x128xf32>
      %44 = vector.shape_cast %43 : vector<1x8x128xf32> to vector<8x128xf32>
      %45 = vector.shape_cast %42 : vector<8x128xf32> to vector<1x8x128xf32>
      tpu.vector_store %arg7[%c0_24, %c0_25, %c0_26], %45 {strides = array<i32>} : memref<1x8x128xf32, #tpu.memory_space<vmem>>, vector<1x8x128xf32>,
    } else {
    }
    return
  }
  func.func @transform_0(%arg0: i32, %arg1: i32) -> (i32, i32) {
    %c2_i32 = arith.constant 2 : i32
    %0 = arith.muli %arg0, %c2_i32 : i32
    %1 = arith.addi %0, %arg1 : i32
    %c1_i32 = arith.constant 1 : i32
    %2 = arith.minsi %1, %c1_i32 : i32
    %c0_i32 = arith.constant 0 : i32
    %c0_i32_0 = arith.constant 0 : i32
    return %2, %c0_i32 : i32, i32
  }
  func.func @transform_1(%arg0: i32, %arg1: i32) -> (i32, i32) {
    %c2_i32 = arith.constant 2 : i32
    %0 = arith.muli %arg0, %c2_i32 : i32
    %1 = arith.addi %0, %arg1 : i32
    %c1_i32 = arith.constant 1 : i32
    %2 = arith.minsi %1, %c1_i32 : i32
    %c0_i32 = arith.constant 0 : i32
    %c0_i32_0 = arith.constant 0 : i32
    return %2, %c0_i32 : i32, i32
  }
  func.func @transform_2(%arg0: i32, %arg1: i32) -> (i32, i32) {
    %c0_i32 = arith.constant 0 : i32
    %c0_i32_0 = arith.constant 0 : i32
    %c0_i32_1 = arith.constant 0 : i32
    return %c0_i32, %c0_i32_0 : i32, i32
  }
  func.func @transform_3(%arg0: i32, %arg1: i32) -> (i32, i32) {
    %c0_i32 = arith.constant 0 : i32
    %c0_i32_0 = arith.constant 0 : i32
    %c0_i32_1 = arith.constant 0 : i32
    return %c0_i32, %c0_i32_0 : i32, i32
  }
  func.func @transform_4(%arg0: i32, %arg1: i32) -> (i32, i32, i32) {
    %c0_i32 = arith.constant 0 : i32
    %c0_i32_0 = arith.constant 0 : i32
    %c0_i32_1 = arith.constant 0 : i32
    return %arg0, %c0_i32, %c0_i32_0 : i32, i32, i32
  }
  func.func @transform_5(%arg0: i32, %arg1: i32) -> (i32, i32, i32) {
    %c0_i32 = arith.constant 0 : i32
    %c0_i32_0 = arith.constant 0 : i32
    %c0_i32_1 = arith.constant 0 : i32
    return %arg0, %c0_i32, %c0_i32_0 : i32, i32, i32
  }
}

</mosaic_0001>

<bundles_post_ra>
// kernel: tpu_custom_call.1
= control target key start
LH: loop header
LB: loop body
LE: loop exit
PB: predicated region body
PF: predicated region fallthrough
CT: control target
= control target key end

     0   :  { %s2540_s0 = inlined_call_operand.hbm [shape: f32[10,128], index: 0, kind: input, shape index: {}]   ;;  %s2541_s1 = inlined_call_operand.hbm [shape: s32[10,32], index: 1, kind: input, shape index: {}]   ;;  %s2542_s2 = inlined_call_operand.hbm [shape: f32[128,128], index: 2, kind: input, shape index: {}]   ;;  %s2543_s3 = inlined_call_operand.hbm [shape: f32[32,128], index: 3, kind: input, shape index: {}]   ;;  %s2544_s4 = inlined_call_operand.hbm [shape: f32[1,8,128], index: 4, kind: output, shape index: {0}]   ;;  %s2545_s5 = inlined_call_operand.hbm [shape: f32[1,8,128], index: 5, kind: output, shape index: {1}]  }
   0x1   :  { %2563 = sst [smem:[#allocation23_spill]] %s2542_s2 }
   0x2   :  { %2564 = sst [smem:[#allocation24_spill]] %s2543_s3 }
   0x3   :  { %11 = vsyncpa [#allocation5], 0 }
   0x4   :  { %13 = vsyncpa [#allocation5 + $0x1], 0 }
   0x5   :  { %14 = vsyncpa [#allocation8], 0 }
   0x6   :  { %16 = vsyncpa [#allocation8 + $0x1], 0 }
   0x7   :  { %17 = vsyncpa [#allocation11], 0 }
   0x8   :  { %18 = vsyncpa [#allocation6], 0 }
   0x9   :  { %19 = vsyncpa [#allocation14], 0  ;;  %s1781_s18 = smov 0   ;;  %s1783_s19 = smov 0  }
   0xa   :  { %s1785_s20 = smov 0   ;;  %s1787_s21 = smov 0  }
   0xb   :  { %s1789_s22 = smov 0   ;;  %s1791_s23 = smov 0  }
   0xc LB: > { %s1812_s24 = sadd.s32 4294967295, %s1742_s23   ;;  %p1364_p0 = scmp.ge.s32.totalorder %s1742_s23, 1  ;;  %s1742_s23 = sphi %s1791_s23, %s25_s23   ;;  %s1738_s22 = sphi %s1789_s22, %s2596_s22   ;;  %s1734_s21 = sphi %s1787_s21, %s2595_s21   ;;  %s1730_s20 = sphi %s1785_s20, %s2594_s20   ;;  %s1726_s19 = sphi %s1783_s19, %s2593_s19   ;;  %s1722_s18 = sphi %s1781_s18, %s2592_s18  }
   0xd   : > { %p66_p1 = scmp.eq.s32.totalorder %s1812_s24, 0  ;;  %p204_p2 = scmp.lt.s32.totalorder %s1742_s23, 3 }
   0xe   : > { %s2565_s2 = sld [smem:[#allocation23_spill]]  ;;  %s1744_s29 = smov [#allocation9]  }
   0xf   : > { %p1820_p3 = pnand %p1364_p0, %p204_p2  ;;  %s217_s30 = sshll.u32 %s1744_s29, 4  ;;  %s218_s30 = int_to_ptr.vmem [resolvable:$true] %s217_s30 }
  0x10   : > { %s2567_s3 = sld [smem:[#allocation24_spill]]  ;;  %s1745_s9 = smov 128  }
  0x11   : > { %p1410_p4 = pneg %p1820_p3  ;;  %s1746_s10 = smov 8  }
  0x12   : > { %s1747_s11 = smov [#allocation10]   ;;  %s34_s13 = sadd.s32 1, %s1738_s22 }
  0x13   : > { %p1411_p5 = pnand %p1410_p4, %p66_p1  ;;  %s231_s12 = sshll.u32 %s1747_s11, 4  ;;  %s232_s12 = int_to_ptr.vmem [resolvable:$true] %s231_s12 }
  0x14   : > { %s215_s27 = sshll.u32 %s2565_s2, 4  ;;  %p43_p6 = scmp.lt.s32.totalorder %s1738_s22, 1  ;;  %s216_s27 = int_to_ptr.hbm [resolvable:$true] %s215_s27 }
  0x15   : > { %1413 = dma.hbm_to_vmem [thread:$0]  (!%p1411_p5), %s216_s27, 2048, %s218_s30, [#allocation8], %s1745_s9, %s1745_s9, %s1746_s10  }
  0x16   : > { %s229_s8 = sshll.u32 %s2567_s3, 4  ;;  %p35_p7 = scmp.ge.s32.totalorder %s34_s13, 2  ;;  %s230_s8 = int_to_ptr.hbm [resolvable:$true] %s229_s8 }
  0x17   : > { %1416 = dma.hbm_to_vmem [thread:$0]  (!%p1411_p5), %s230_s8, 512, %s232_s12, [#allocation11], %s1745_s9, %s1745_s9, %s1746_s10  }
  0x18   : > { %s52_s14 = sadd.s32 1, %s1730_s20  ;;  %s2598_s13 = smov (%p35_p7, %s34_s13), 0 }
  0x19   : > { %s44_s15 = scalar_select %p43_p6, %s1738_s22, 1 }
  0x1a   : > { %p59_p8 = scmp.ne.s32.totalorder %s1730_s20, %s1726_s19  ;;  %p60_p9 = scmp.eq.s32.totalorder %s1742_s23, 0 }
  0x1b   : > { %p47_p10 = scmp.lt.s32.totalorder %s2598_s13, 1  ;;  %p65_p11 = scmp.ne.s32.totalorder %s1726_s19, %s1722_s18 }
  0x1c   : > { %p1843_p12 = por %p60_p9, %p59_p8  ;;  %p1426_p13 = scmp.lt.s32.totalorder %s1742_s23, 2 }
  0x1d   : > { %s48_s17 = scalar_select %p47_p10, %s2598_s13, 1 }
  0x1e   : > { %p1851_p0 = por %p66_p1, %p65_p11  ;;  %s245_s26 = sand.u32 1, %s1730_s20  }
  0x1f   : > { %s49_s27 = ssub.s32 %s44_s15, %s48_s17  ;;  %s1368_s29 = sshll.u32 %s245_s26, 3 }
  0x20   : > { %p50_p2 = scmp.eq.s32.totalorder %s49_s27, 0  ;;  %s1369_s30 = sshll.u32 %s44_s15, 3 }
  0x21   : > { %s257_s8 = scalar_lea.hbm %s2540_s0, %s1369_s30  ;;  %s249_s9 = scalar_lea.vmem [#allocation4], %s1368_s29 }
  0x22   : > { %s1857_s18 = scalar_select %p50_p2, %s1730_s20, %s52_s14  }
  0x23   : > { %s261_s10 = sshll.u32 %s249_s9, 4  ;;  %s259_s11 = sshll.u32 %s257_s8, 4  ;;  %s262_s10 = int_to_ptr.vmem [resolvable:$true] %s261_s10  ;;  %s260_s11 = int_to_ptr.hbm [resolvable:$true] %s259_s11 }
  0x24   : > { %p1418_p4 = pnand %p1426_p13, %p1843_p12  ;;  %s280_s17 = scalar_lea.hbm %s2541_s1, %s1369_s30 }
  0x25   : > { %s268_s27 = sand.u32 1, %s1742_s23   ;;  %s246_s15 = scalar_lea.sflag [#allocation5], %s245_s26 }
  0x26   : > { %1420 = dma.hbm_to_vmem [thread:$0]  (!%p1418_p4), %s260_s11, 128, %s262_s10, %s246_s15  }
  0x27   : > { %s282_s14 = sshll.u32 %s280_s17, 4  ;;  %s272_s3 = scalar_lea.vmem [#allocation7], %s1368_s29  ;;  %s283_s14 = int_to_ptr.hbm [resolvable:$true] %s282_s14 }
  0x28   : > { %s284_s6 = sshll.u32 %s272_s3, 4  ;;  %s269_s7 = scalar_lea.sflag [#allocation8], %s268_s27  ;;  %s285_s6 = int_to_ptr.vmem [resolvable:$true] %s284_s6 }
  0x29   : > { %1423 = dma.hbm_to_vmem [thread:$0]  (!%p1418_p4), %s283_s14, 128, %s285_s6, %s269_s7  }
  0x2a   : > { %293 = sbr.rel (%p1820_p3) target bundleno = 713 (0x2c9), region = 36 }
  0x2f   : > { %s295_s16 = sand.u32 1, %s1726_s19  }
  0x30   : > { %s1373_s8 = sshll.u32 %s295_s16, 3  ;;  %s296_s9 = scalar_lea.sflag [#allocation5], %s295_s16 }
  0x31   : > { %s299_s2 = scalar_lea.vmem [#allocation4], %s1373_s8 }
  0x32   : > { %1697 = dma.done.wait (%p1851_p0), %s296_s9, 128  }
  0x33   : > { %1699 = vsyncadd (%p1851_p0), %s296_s9, 4294967168  ;;  %s305_s3 = sand.u32 1, %s1812_s24   ;;  %s309_s29 = scalar_lea.vmem [#allocation7], %s1373_s8 }
  0x34   : > { %s306_s26 = scalar_lea.sflag [#allocation8], %s305_s3 }
  0x35   : > { %1701 = dma.done.wait (%p1851_p0), %s306_s26, 128  }
  0x36   : > { %1703 = vsyncadd (%p1851_p0), %s306_s26, 4294967168 }
  0x37   : > { %1705 = dma.done.wait (%p66_p1), [#allocation8], 2048  }
  0x38   : > { %1707 = vsyncadd (%p66_p1), [#allocation8], 4294965248 }
  0x39   : > { %1709 = dma.done.wait (%p66_p1), [#allocation11], 512  }
  0x3a   : > { %1711 = vsyncadd (%p66_p1), [#allocation11], 4294966784  ;;  %p1377_p3 = scmp.ne.s32.totalorder %s1734_s21, 0 }
  0x3c   : > { %358 = sbr.rel (%p1377_p3) target bundleno = 68 (0x44), region = 56 }
  0x41   : > { %v1748_v0 = vmov 0.0  }
  0x42   : > { %359 = vst [vmem:[#allocation2] sm:$0xff] %v1748_v0 }
  0x43   : > { %360 = vst [vmem:[#allocation3] sm:$0xff] %v1748_v0 }
  0x44 PF: > { %s1378_s28 = sshll.u32 %s1734_s21, 3  ;;  %v1892_v1 = vld [vmem:[%s299_s2] sm:$0xff]  ;;  %v1894_v2 = vld [vmem:[%s309_s29] sm:$0xff]  ;;  %v2546_v4 = vlaneseq }
  0x45   : > { %v1896_v3 = vld [vmem:[#allocation9] sm:$0xff]  ;;  %v1898_v5 = vld [vmem:[#allocation9 + $0x8] sm:$0xff]  ;;  %v1900_v6 = vld [vmem:[#allocation9 + $0x10] sm:$0xff]  ;;  %s1906_s25 = sadd.s32 8, %s1378_s28 }
  0x46   : > { %2570 = vst [vmem:[#allocation21_spill] sm:$0xff] %v1896_v3  ;;  %v1902_v7 = vld [vmem:[#allocation9 + $0x18] sm:$0xff]  ;;  %v1908_v8 = vld [vmem:[#allocation9 + $0x20] sm:$0xff]  ;;  %v1910_v9 = vld [vmem:[#allocation9 + $0x28] sm:$0xff]  ;;  %v387_v11 = vand.u32 127, %v2546_v4  ;;  %p1379_p1 = scmp.gt.s32.totalorder %s1906_s25, 10 }
  0x47   : > { %2571 = vst [vmem:[#allocation22_spill] sm:$0xff] %v1898_v5  ;;  %v1912_v10 = vld [vmem:[#allocation9 + $0x30] sm:$0xff]  ;;  %v1915_v12 = vld [vmem:[#allocation9 + $0x38] sm:$0xff]  ;;  %v1917_v13 = vld [vmem:[#allocation9 + $0x40] sm:$0xff] }
  0x48   : > { %v1919_v14 = vld [vmem:[#allocation9 + $0x48] sm:$0xff]  ;;  %v1921_v15 = vld [vmem:[#allocation9 + $0x50] sm:$0xff]  ;;  %v1923_v16 = vld [vmem:[#allocation9 + $0x58] sm:$0xff]  ;;  %v392_v18 = vand.u32 3, %v387_v11  ;;  %405 = sbr.rel (%p1379_p1) target bundleno = 377 (0x179), region = 60 }
  0x49   : > { %v1925_v17 = vld [vmem:[#allocation9 + $0x60] sm:$0xff]  ;;  %v1927_v19 = vld [vmem:[#allocation9 + $0x68] sm:$0xff]  ;;  %v1929_v20 = vld [vmem:[#allocation9 + $0x70] sm:$0xff] }
  0x4a   : > { %v1931_v21 = vld [vmem:[#allocation9 + $0x78] sm:$0xff]  ;;  %v1933_v22 = vld [vmem:[#allocation10] sm:$0xff]  ;;  %v1935_v23 = vld [vmem:[#allocation10 + $0x8] sm:$0xff]  ;;  %v1939_v25 = vcvt.s32.f32 %v392_v18 }
  0x4b   : > { %v1937_v24 = vld [vmem:[#allocation10 + $0x10] sm:$0xff]  ;;  %v1941_v26 = vld [vmem:[#allocation10 + $0x18] sm:$0xff] }
  0x4d   : > { %406 = vmax.xlane.f32.xlu0 %v1892_v1  ;;  %v1946_v27 = vand.u32 4294901760, %v1931_v21  ;;  %v1949_v28 = vand.u32 4294901760, %v1929_v20  ;;  %v1952_v29 = vand.u32 4294901760, %v1927_v19  ;;  %v1955_v30 = vand.u32 4294901760, %v1925_v17 }
  0x4e   : > { %v1958_v31 = vand.u32 4294901760, %v1923_v16  ;;  %v1961_v32 = vand.u32 4294901760, %v1921_v15  ;;  %v1964_v33 = vand.u32 4294901760, %v1919_v14  ;;  %v1992_v40 = vand.u32 4294901760, %v1917_v13 }
  0x4f   : > { %v1968_v34 = vsub.f32 %v1931_v21, %v1946_v27  ;;  %v1972_v35 = vsub.f32 %v1929_v20, %v1949_v28  ;;  %v1976_v36 = vsub.f32 %v1927_v19, %v1952_v29  ;;  %v1980_v37 = vsub.f32 %v1925_v17, %v1955_v30  ;;  %412 = vmatpush.msra.mxu0 %v1946_v27 }
  0x50   : > { %v1985_v38 = vsub.f32 %v1923_v16, %v1958_v31  ;;  %v1989_v39 = vsub.f32 %v1921_v15, %v1961_v32  ;;  %608 = vmatpush.msra.mxu3 %v1946_v27  ;;  %v2004_v46 = vsub.f32 %v1919_v14, %v1964_v33  ;;  %v2020_v51 = vsub.f32 %v1917_v13, %v1992_v40 }
  0x51   : > { %v2556_v41 = vand.u32 4294901760, %v1968_v34  ;;  %v2555_v42 = vand.u32 4294901760, %v1972_v35  ;;  %v2553_v43 = vand.u32 4294901760, %v1976_v36  ;;  %v2551_v44 = vand.u32 4294901760, %v1980_v37  ;;  %414 = vmatpush.msra.mxu0 %v1949_v28  ;;  %555 = vmatpush.msra.mxu2 %v1968_v34 }
  0x52   : > { %v2550_v45 = vand.u32 4294901760, %v1985_v38  ;;  %610 = vmatpush.msra.mxu3 %v1949_v28  ;;  %v2548_v50 = vand.u32 4294901760, %v1989_v39  ;;  %v2547_v56 = vand.u32 4294901760, %v2004_v46  ;;  %v2035_v58 = vand.u32 4294901760, %v1915_v12 }
  0x53   : > { %v455_v47 = vsub.f32 %v1968_v34, %v2556_v41  ;;  %v461_v48 = vsub.f32 %v1972_v35, %v2555_v42  ;;  %v467_v49 = vsub.f32 %v1976_v36, %v2553_v43  ;;  %416 = vmatpush.msra.mxu0 %v1952_v29  ;;  %558 = vmatpush.msra.mxu2 %v1972_v35  ;;  %v2038_v59 = vand.u32 4294901760, %v1912_v10 }
  0x54   : > { %v473_v54 = vsub.f32 %v1980_v37, %v2551_v44  ;;  %612 = vmatpush.msra.mxu3 %v1952_v29  ;;  %v479_v55 = vsub.f32 %v1985_v38, %v2550_v45  ;;  %v2041_v60 = vand.u32 4294901760, %v1910_v9  ;;  %v485_v61 = vsub.f32 %v1989_v39, %v2548_v50 }
  0x55   : > { %v456_v52 = vand.u32 4294901760, %v455_v47  ;;  %v462_v53 = vand.u32 4294901760, %v461_v48  ;;  %418 = vmatpush.msra.mxu0 %v1955_v30  ;;  %561 = vmatpush.msra.mxu2 %v1976_v36  ;;  %v468_v57 = vand.u32 4294901760, %v467_v49  ;;  %v2549_v62 = vand.u32 4294901760, %v2020_v51 }
  0x56   : > { %614 = vmatpush.msra.mxu3 %v1955_v30  ;;  %v474_v63 = vand.u32 4294901760, %v473_v54  ;;  %v2051_v0 = vsub.f32 %v1915_v12, %v2035_v58  ;;  %v2056_v11 = vsub.f32 %v1912_v10, %v2038_v59  ;;  %v2059_v18 = vand.u32 4294901760, %v1908_v8 }
  0x57   : > { %457 = vmatpush.msra.mxu1 %v456_v52  ;;  %420 = vmatpush.msra.mxu0 %v1958_v31  ;;  %v491_v47 = vsub.f32 %v2004_v46, %v2547_v56  ;;  %v480_v48 = vand.u32 4294901760, %v479_v55  ;;  %v2069_v52 = vsub.f32 %v1910_v9, %v2041_v60  ;;  %v497_v54 = vsub.f32 %v2020_v51, %v2549_v62 }
  0x58   : > { %564 = vmatpush.msra.mxu2 %v1980_v37  ;;  %v2552_v49 = vand.u32 4294901760, %v2051_v0  ;;  %616 = vmatpush.msra.mxu3 %v1958_v31  ;;  %v486_v55 = vand.u32 4294901760, %v485_v61  ;;  %v2083_v4 = vsub.f32 %v1908_v8, %v2059_v18  ;;  %v2086_v56 = vand.u32 4294901760, %v1900_v6 }
  0x59   : > { %463 = vmatpush.msra.mxu1 %v462_v53  ;;  %422 = vmatpush.msra.mxu0 %v1961_v32  ;;  %v2072_v53 = vand.u32 4294901760, %v1902_v7  ;;  %v492_v50 = vand.u32 4294901760, %v491_v47  ;;  %v2557_v61 = vand.u32 4294901760, %v2069_v52  ;;  %v2099_v45 = vand.u32 4294901760, %v1898_v5 }
  0x5a   : > { %567 = vmatpush.msra.mxu2 %v1985_v38  ;;  %v498_v44 = vand.u32 4294901760, %v497_v54  ;;  %618 = vmatpush.msra.mxu3 %v1961_v32  ;;  %v2113_v43 = vand.u32 4294901760, %v1896_v3  ;;  %vm769_vm0 = vcmask 261120  }
  0x5b   : > { %469 = vmatpush.msra.mxu1 %v468_v57  ;;  %424 = vmatpush.msra.mxu0 %v1964_v33  ;;  %v2554_v57 = vand.u32 4294901760, %v2056_v11  ;;  %v2096_v62 = vsub.f32 %v1902_v7, %v2072_v53  ;;  %v2124_v42 = vsub.f32 %v1898_v5, %v2099_v45 }
  0x5c   : > { %570 = vmatpush.msra.mxu2 %v1989_v39  ;;  %620 = vmatpush.msra.mxu3 %v1964_v33 }
  0x5d   : > { %475 = vmatpush.msra.mxu1 %v474_v63  ;;  %426 = vmatpush.msra.mxu0 %v1992_v40  ;;  %v503_v63 = vsub.f32 %v2051_v0, %v2552_v49  ;;  %v509_v47 = vsub.f32 %v2056_v11, %v2554_v57  ;;  %v2110_v49 = vsub.f32 %v1900_v6, %v2086_v56 }
  0x5e   : > { %573 = vmatpush.msra.mxu2 %v2004_v46  ;;  %622 = vmatpush.msra.mxu3 %v1992_v40 }
  0x5f   : > { %481 = vmatpush.msra.mxu1 %v480_v48  ;;  %428 = vmatpush.msra.mxu0 %v2035_v58  ;;  %v2558_v48 = vand.u32 4294901760, %v2083_v4  ;;  %v504_v54 = vand.u32 4294901760, %v503_v63  ;;  %v510_v41 = vand.u32 4294901760, %v509_v47 }
  0x60   : > { %576 = vmatpush.msra.mxu2 %v2020_v51  ;;  %624 = vmatpush.msra.mxu3 %v2035_v58 }
  0x61   : > { %487 = vmatpush.msra.mxu1 %v486_v55  ;;  %430 = vmatpush.msra.mxu0 %v2038_v59  ;;  %v515_v55 = vsub.f32 %v2069_v52, %v2557_v61  ;;  %v2135_v61 = vsub.f32 %v1896_v3, %v2113_v43  ;;  %v2573_v3 = vand.u32 4294901760, %v2110_v49 }
  0x62   : > { %579 = vmatpush.msra.mxu2 %v2051_v0  ;;  %626 = vmatpush.msra.mxu3 %v2038_v59 }
  0x63   : > { %493 = vmatpush.msra.mxu1 %v492_v50  ;;  %432 = vmatpush.msra.mxu0 %v2041_v60  ;;  %v521_v50 = vsub.f32 %v2083_v4, %v2558_v48  ;;  %v516_v57 = vand.u32 4294901760, %v515_v55  ;;  %v538_v48 = vand.u32 4294901760, %v2124_v42  ;;  %v533_v5 = vsub.f32 %v2110_v49, %v2573_v3 }
  0x64   : > { %582 = vmatpush.msra.mxu2 %v2056_v11  ;;  %628 = vmatpush.msra.mxu3 %v2041_v60 }
  0x65   : > { %499 = vmatpush.msra.mxu1 %v498_v44  ;;  %434 = vmatpush.msra.mxu0 %v2059_v18  ;;  %v2572_v44 = vand.u32 4294901760, %v2096_v62  ;;  %v522_v63 = vand.u32 4294901760, %v521_v50  ;;  %v534_v3 = vand.u32 4294901760, %v533_v5  ;;  %v2574_v50 = vand.u32 4294901760, %v1968_v34 }
  0x66   : > { %585 = vmatpush.msra.mxu2 %v2069_v52  ;;  %630 = vmatpush.msra.mxu3 %v2059_v18  ;;  %v2577_v34 = vand.u32 4294901760, %v1980_v37  ;;  %v2580_v37 = vand.u32 4294901760, %v2004_v46 }
  0x67   : > { %505 = vmatpush.msra.mxu1 %v504_v54  ;;  %v527_v47 = vsub.f32 %v2096_v62, %v2572_v44  ;;  %436 = vmatpush.msra.mxu0 %v2072_v53  ;;  %v544_v54 = vand.u32 4294901760, %v2135_v61  ;;  %v539_v44 = vsub.f32 %v2124_v42, %v538_v48 }
  0x68   : > { %588 = vmatpush.msra.mxu2 %v2083_v4  ;;  %632 = vmatpush.msra.mxu3 %v2072_v53 }
  0x69   : > { %511 = vmatpush.msra.mxu1 %v510_v41  ;;  %438 = vmatpush.msra.mxu0 %v2086_v56  ;;  %v528_v55 = vand.u32 4294901760, %v527_v47  ;;  %v545_v41 = vsub.f32 %v2135_v61, %v544_v54  ;;  %v2575_v47 = vand.u32 4294901760, %v1972_v35  ;;  %v2578_v35 = vand.u32 4294901760, %v1985_v38 }
  0x6a   : > { %591 = vmatpush.msra.mxu2 %v2096_v62  ;;  %634 = vmatpush.msra.mxu3 %v2086_v56  ;;  %v2582_v38 = vand.u32 4294901760, %v2051_v0 }
  0x6b   : > { %517 = vmatpush.msra.mxu1 %v516_v57  ;;  %440 = vmatpush.msra.mxu0 %v2099_v45  ;;  %v540_v57 = vand.u32 4294901760, %v539_v44  ;;  %v546_v5 = vand.u32 4294901760, %v545_v41 }
  0x6c   : > { %594 = vmatpush.msra.mxu2 %v2110_v49  ;;  %636 = vmatpush.msra.mxu3 %v2099_v45 }
  0x6d   : > { %523 = vmatpush.msra.mxu1 %v522_v63  ;;  %442 = vmatpush.msra.mxu0 %v2113_v43  ;;  %v2576_v63 = vand.u32 4294901760, %v1976_v36  ;;  %v2579_v36 = vand.u32 4294901760, %v1989_v39 }
  0x6e   : > { %597 = vmatpush.msra.mxu2 %v2124_v42  ;;  %638 = vmatpush.msra.mxu3 %v2113_v43 }
  0x6f   : > { %649 = vmatpush.msrb.mxu0 %v2574_v50  ;;  %529 = vmatpush.msra.mxu1 %v528_v55 }
  0x70   : > { %600 = vmatpush.msra.mxu2 %v2135_v61 }
  0x71   : > { %653 = vmatpush.msrb.mxu0 %v2575_v47  ;;  %535 = vmatpush.msra.mxu1 %v534_v3 }
  0x72   : > { %785 = vmatpush.msrb.mxu2 %v1941_v26 }
  0x73   : > { %657 = vmatpush.msrb.mxu0 %v2576_v63  ;;  %541 = vmatpush.msra.mxu1 %v540_v57 }
  0x74   : > { %786 = vmatpush.msrb.mxu2 %v1937_v24 }
  0x75   : > { %661 = vmatpush.msrb.mxu0 %v2577_v34  ;;  %547 = vmatpush.msra.mxu1 %v546_v5 }
  0x76   : > { %787 = vmatpush.msrb.mxu2 %v1935_v23 }
  0x77   : > { %716 = vmatpush.msrb.mxu1 %v1946_v27  ;;  %665 = vmatpush.msrb.mxu0 %v2578_v35  ;;  %v2581_v27 = vand.u32 4294901760, %v2020_v51  ;;  %v795_v35 = vld [vmem:[#allocation3] sm:$0xff] }
  0x78   : > { %788 = vmatpush.msrb.mxu2 %v1933_v22 }
  0x79   : > { %718 = vmatpush.msrb.mxu1 %v1949_v28  ;;  %669 = vmatpush.msrb.mxu0 %v2579_v36  ;;  %v2583_v28 = vand.u32 4294901760, %v2056_v11 }
  0x7b   : > { %720 = vmatpush.msrb.mxu1 %v1952_v29  ;;  %673 = vmatpush.msrb.mxu0 %v2580_v37  ;;  %v2584_v29 = vand.u32 4294901760, %v2069_v52  ;;  %v799_v37 = vld [vmem:[#allocation2] sm:$0xff] }
  0x7d   : > { %722 = vmatpush.msrb.mxu1 %v1955_v30  ;;  %677 = vmatpush.msrb.mxu0 %v2581_v27  ;;  %v2585_v30 = vand.u32 4294901760, %v2083_v4 }
  0x7f   : > { %724 = vmatpush.msrb.mxu1 %v1958_v31  ;;  %681 = vmatpush.msrb.mxu0 %v2582_v38  ;;  %v2586_v31 = vand.u32 4294901760, %v2096_v62 }
  0x81   : > { %726 = vmatpush.msrb.mxu1 %v1961_v32  ;;  %685 = vmatpush.msrb.mxu0 %v2583_v28  ;;  %v2587_v32 = vand.u32 4294901760, %v2110_v49 }
  0x83   : > { %728 = vmatpush.msrb.mxu1 %v1964_v33  ;;  %689 = vmatpush.msrb.mxu0 %v2584_v29 }
  0x85   : > { %730 = vmatpush.msrb.mxu1 %v1992_v40  ;;  %693 = vmatpush.msrb.mxu0 %v2585_v30 }
  0x87   : > { %732 = vmatpush.msrb.mxu1 %v2035_v58  ;;  %697 = vmatpush.msrb.mxu0 %v2586_v31 }
  0x89   : > { %734 = vmatpush.msrb.mxu1 %v2038_v59  ;;  %701 = vmatpush.msrb.mxu0 %v2587_v32 }
  0x8b   : > { %736 = vmatpush.msrb.mxu1 %v2041_v60  ;;  %705 = vmatpush.msrb.mxu0 %v538_v48 }
  0x8d   : > { %738 = vmatpush.msrb.mxu1 %v2059_v18  ;;  %709 = vmatpush.msrb.mxu0 %v544_v54 }
  0x8f   : > { %740 = vmatpush.msrb.mxu1 %v2072_v53 }
  0x91   : > { %742 = vmatpush.msrb.mxu1 %v2086_v56  ;;  %v768_v56 = vcvt.s32.f32 %v1894_v2 }
  0x93   : > { %744 = vmatpush.msrb.mxu1 %v2099_v45 }
  0x95   : > { %746 = vmatpush.msrb.mxu1 %v2113_v43 }
  0xc0   : > { %v407_v4 = vpop.xlane.xlu0 %406 }
  0xc1   : > { %v408_v33 = vsub.f32 %v1892_v1, %v407_v4 }
  0xc3   : > { %v409_v39 = vmul.f32 1.442695, %v408_v33 }
  0xc5   : > { %1488 = vpow2.f32 %v409_v39 }
  0xcb   : > { %v1489_v40 = vpop.eup %1488 }
  0xcc   : > { %v443_v42 = vand.u32 4294901760, %v1489_v40 }
  0xce   : > { %549 = vmatmul.f32.vlgmr.msra.gmra.mxu1 %v443_v42  ;;  %v444_v46 = vsub.f32 %v1489_v40, %v443_v42 }
  0xd0   : > { %603 = vmatmul.f32.vlgmr.msra.gmra.mxu2 %v444_v46  ;;  %v445_v51 = vand.u32 4294901760, %v444_v46 }
  0xd2   : > { %642 = vmatmul.f32.vlgmr.msra.gmra.mxu3 %v445_v51  ;;  %v446_v58 = vsub.f32 %v444_v46, %v445_v51 }
  0xd4   : > { %v447_v59 = vand.u32 4294901760, %v446_v58 }
  0xd6   : > { %448 = vmatmul.f32.vlgmr.msra.gmra.mxu0 %v447_v59  ;;  %748 = vmatmul.f32.vlgmr.msrb.gmra.mxu1 %v443_v42 }
  0xd8   : > { %1380 = vmatmul.msk.f32.vlgmr.msrb.gmra.mxu2 %vm769_vm0, %v768_v56 }
  0xde   : > { %711 = vmatmul.f32.vlgmr.msrb.gmra.mxu0 %v443_v42 }
 0x14b   : > { %v550_v43 = vpop.f32.mrf.mxu1 }
 0x153   : > { %v449_v45 = vpop.f32.mrf.mxu0  ;;  %v604_v62 = vpop.f32.mrf.mxu2 }
 0x154   : > { %v551_v60 = vadd.f32 %v550_v43, %v449_v45  ;;  %v749_v53 = vpop.f32.mrf.mxu1 }
 0x155   : > { %v643_v11 = vpop.f32.mrf.mxu3 }
 0x156   : > { %v605_v0 = vadd.f32 %v604_v62, %v551_v60 }
 0x158   : > { %v644_v18 = vadd.f32 %v643_v11, %v605_v0 }
 0x15b   : > { %v712_v49 = vpop.f32.mrf.mxu0  ;;  %v790_v47 = vpop.f32.mrf.mxu2 }
 0x15c   : > { %v713_v52 = vadd.f32 %v712_v49, %v644_v18  ;;  %vm793_vm5 = vcmp.eq.f32.partialorder %v1939_v25, %v790_v47 }
 0x15e   : > { %v750_v61 = vadd.f32 %v749_v53, %v713_v52 }
 0x160   : > { %v752_v48 = vmax.f32 %v750_v61, 1e-30 }
 0x162   : > { %1490 = vrcp.f32 %v752_v48  ;;  %v764_v3 = vand.u32 2147483648, %v752_v48  ;;  %v762_v50 = vand.u32 2147483647, %v752_v48  ;;  %vm758_vm2 = vweird.f32 %v752_v48 }
 0x164   : > { %v765_v5 = vor.u32 1.1754944e-38, %v764_v3  ;;  %vm763_vm4 = vcmp.eq.f32.partialorder %v762_v50, 8.507059e+37 }
 0x168   : > { %v1491_v54 = vpop.eup %1490 }
 0x169   : > { %v754_v55 = vmul.f32 %v1491_v54, %v752_v48  ;;  %vm759_vm1 = vweird.f32 %v1491_v54 }
 0x16a   : > { %vm760_vm3 = vmor %vm758_vm2, %vm759_vm1 }
 0x16b   : > { %v755_v44 = vsub.f32 1.0, %v754_v55 }
 0x16d   : > { %v756_v41 = vmul.f32 %v1491_v54, %v755_v44 }
 0x16f   : > { %v757_v57 = vadd.f32 %v1491_v54, %v756_v41 }
 0x171   : > { %v761_v63 = vsel %vm760_vm3, %v1491_v54, %v757_v57 }
 0x172   : > { %v766_v34 = vsel %vm763_vm4, %v765_v5, %v761_v63 }
 0x173   : > { %v767_v36 = vmul.f32 %v1489_v40, %v766_v34 }
 0x175   : > { %v794_v27 = vsel %vm793_vm5, %v767_v36, 0.0  ;;  %v797_v38 = vadd.f32 %v795_v35, %v767_v36 }
 0x176   : > { %v801_v28 = vadd.f32 %v799_v37, %v794_v27 }
 0x177   : > { %798 = vst [vmem:[#allocation3] sm:$0xff] %v797_v38 }
 0x178   : > { %802 = vst [vmem:[#allocation2] sm:$0xff] %v801_v28 }
 0x179 PF: > { %p1381_p5 = scmp.le.s32.totalorder %s1906_s25, 10 }
 0x17b   : > { %806 = sbr.rel (%p1381_p5) target bundleno = 693 (0x2b5), region = 64 }
 0x180   : > { %v2588_v29 = vlaneseq  ;;  %v809_v31 = vstv %s1378_s28  ;;  %v2221_v32 = vand.u32 4294901760, %v1931_v21  ;;  %v2224_v4 = vand.u32 4294901760, %v1929_v20 }
 0x181   : > { %v2227_v33 = vand.u32 4294901760, %v1927_v19  ;;  %v2230_v39 = vand.u32 4294901760, %v1925_v17  ;;  %v2233_v40 = vand.u32 4294901760, %v1923_v16  ;;  %v2236_v42 = vand.u32 4294901760, %v1921_v15 }
 0x182   : > { %v808_v30 = vshrl.u32 %v2588_v29, 7  ;;  %v2242_v51 = vsub.f32 %v1931_v21, %v2221_v32  ;;  %v2246_v58 = vsub.f32 %v1929_v20, %v2224_v4  ;;  %821 = vmatpush.msra.mxu0 %v2221_v32  ;;  %v2250_v59 = vand.u32 4294901760, %v1919_v14  ;;  %1017 = vmatpush.msra.mxu3 %v2221_v32 }
 0x183   : > { %v2255_v56 = vsub.f32 %v1927_v19, %v2227_v33  ;;  %v2259_v43 = vsub.f32 %v1925_v17, %v2230_v39  ;;  %v2263_v21 = vsub.f32 %v1923_v16, %v2233_v40  ;;  %v2267_v20 = vsub.f32 %v1921_v15, %v2236_v42 }
 0x184   : > { %v2238_v46 = vadd.s32 %v809_v31, %v808_v30  ;;  %v863_v45 = vand.u32 4294901760, %v2242_v51  ;;  %v869_v60 = vand.u32 4294901760, %v2246_v58  ;;  %823 = vmatpush.msra.mxu0 %v2224_v4  ;;  %964 = vmatpush.msra.mxu2 %v2242_v51  ;;  %v2283_v19 = vsub.f32 %v1919_v14, %v2250_v59 }
 0x185   : > { %v875_v16 = vand.u32 4294901760, %v2255_v56  ;;  %v881_v15 = vand.u32 4294901760, %v2259_v43  ;;  %1019 = vmatpush.msra.mxu3 %v2224_v4  ;;  %v887_v0 = vand.u32 4294901760, %v2263_v21  ;;  %v893_v18 = vand.u32 4294901760, %v2267_v20 }
 0x186   : > { %vm811_vm6 = vcmp.lt.s32.totalorder %v2238_v46, 10  ;;  %v864_v62 = vsub.f32 %v2242_v51, %v863_v45  ;;  %825 = vmatpush.msra.mxu0 %v2227_v33  ;;  %v2303_v49 = vand.u32 4294901760, %v1917_v13  ;;  %967 = vmatpush.msra.mxu2 %v2246_v58  ;;  %v899_v61 = vand.u32 4294901760, %v2283_v19 }
 0x187   : > { %v2277_v17 = vsel %vm811_vm6, %v1892_v1, 0.0  ;;  %v870_v1 = vsub.f32 %v2246_v58, %v869_v60  ;;  %v876_v14 = vsub.f32 %v2255_v56, %v875_v16  ;;  %v882_v11 = vsub.f32 %v2259_v43, %v881_v15  ;;  %1021 = vmatpush.msra.mxu3 %v2227_v33 }
 0x188   : > { %815 = vmax.xlane.f32.xlu0 %v2277_v17  ;;  %v865_v52 = vand.u32 4294901760, %v864_v62  ;;  %827 = vmatpush.msra.mxu0 %v2230_v39  ;;  %v2311_v48 = vsub.f32 %v1917_v13, %v2303_v49  ;;  %v888_v55 = vsub.f32 %v2263_v21, %v887_v0  ;;  %v2320_v44 = vand.u32 4294901760, %v1915_v12 }
 0x189   : > { %v871_v53 = vand.u32 4294901760, %v870_v1  ;;  %970 = vmatpush.msra.mxu2 %v2255_v56  ;;  %1023 = vmatpush.msra.mxu3 %v2230_v39  ;;  %v877_v54 = vand.u32 4294901760, %v876_v14  ;;  %v2323_v3 = vand.u32 4294901760, %v1912_v10  ;;  %v883_v13 = vand.u32 4294901760, %v882_v11 }
 0x18a   : > { %866 = vmatpush.msra.mxu1 %v865_v52  ;;  %829 = vmatpush.msra.mxu0 %v2233_v40  ;;  %v894_v41 = vsub.f32 %v2267_v20, %v893_v18  ;;  %v2329_v50 = vand.u32 4294901760, %v1910_v9  ;;  %v905_v57 = vand.u32 4294901760, %v2311_v48  ;;  %v2336_v47 = vsub.f32 %v1915_v12, %v2320_v44 }
 0x18b   : > { %973 = vmatpush.msra.mxu2 %v2259_v43  ;;  %1025 = vmatpush.msra.mxu3 %v2233_v40  ;;  %v2341_v5 = vsub.f32 %v1912_v10, %v2323_v3  ;;  %v2344_v63 = vand.u32 4294901760, %v1908_v8  ;;  %v900_v34 = vsub.f32 %v2283_v19, %v899_v61  ;;  %v889_v35 = vand.u32 4294901760, %v888_v55 }
 0x18c   : > { %872 = vmatpush.msra.mxu1 %v871_v53  ;;  %831 = vmatpush.msra.mxu0 %v2236_v42  ;;  %v911_v12 = vand.u32 4294901760, %v2336_v47  ;;  %v2354_v36 = vsub.f32 %v1910_v9, %v2329_v50  ;;  %v2357_v10 = vand.u32 4294901760, %v1902_v7  ;;  %v2360_v37 = vand.u32 4294901760, %v1900_v6  ;;  %v2590_v53 = vld [vmem:[#allocation21_spill] sm:$0xff] }
 0x18d   : > { %976 = vmatpush.msra.mxu2 %v2263_v21  ;;  %1027 = vmatpush.msra.mxu3 %v2236_v42  ;;  %v895_v27 = vand.u32 4294901760, %v894_v41  ;;  %v906_v38 = vsub.f32 %v2311_v48, %v905_v57  ;;  %v917_v28 = vand.u32 4294901760, %v2341_v5  ;;  %v2371_v9 = vsub.f32 %v1908_v8, %v2344_v63  ;;  %v2589_v8 = vld [vmem:[#allocation22_spill] sm:$0xff] }
 0x18e   : > { %878 = vmatpush.msra.mxu1 %v877_v54  ;;  %833 = vmatpush.msra.mxu0 %v2250_v59  ;;  %v901_v29 = vand.u32 4294901760, %v900_v34  ;;  %v912_v30 = vsub.f32 %v2336_v47, %v911_v12  ;;  %v923_v31 = vand.u32 4294901760, %v2354_v36  ;;  %v2382_v62 = vsub.f32 %v1902_v7, %v2357_v10 }
 0x18f   : > { %979 = vmatpush.msra.mxu2 %v2267_v20  ;;  %1029 = vmatpush.msra.mxu3 %v2250_v59  ;;  %v2385_v1 = vand.u32 4294901760, %v2589_v8  ;;  %v2389_v14 = vsub.f32 %v1900_v6, %v2360_v37  ;;  %v907_v11 = vand.u32 4294901760, %v906_v38  ;;  %v918_v52 = vsub.f32 %v2341_v5, %v917_v28 }
 0x190   : > { %884 = vmatpush.msra.mxu1 %v883_v13  ;;  %835 = vmatpush.msra.mxu0 %v2303_v49  ;;  %v929_v7 = vand.u32 4294901760, %v2371_v9  ;;  %v2399_v54 = vand.u32 4294901760, %v2590_v53  ;;  %v913_v6 = vand.u32 4294901760, %v912_v30  ;;  %v924_v55 = vsub.f32 %v2354_v36, %v923_v31 }
 0x191   : > { %982 = vmatpush.msra.mxu2 %v2283_v19  ;;  %1031 = vmatpush.msra.mxu3 %v2303_v49  ;;  %v935_v13 = vand.u32 4294901760, %v2382_v62  ;;  %v2410_v41 = vsub.f32 %v2589_v8, %v2385_v1  ;;  %v919_v34 = vand.u32 4294901760, %v918_v52  ;;  %vm1178_vm7 = vcmask 261120  }
 0x192   : > { %890 = vmatpush.msra.mxu1 %v889_v35  ;;  %837 = vmatpush.msra.mxu0 %v2320_v44  ;;  %v930_v35 = vsub.f32 %v2371_v9, %v929_v7  ;;  %v2421_v38 = vsub.f32 %v2590_v53, %v2399_v54 }
 0x193   : > { %985 = vmatpush.msra.mxu2 %v2311_v48  ;;  %1033 = vmatpush.msra.mxu3 %v2320_v44  ;;  %v936_v30 = vsub.f32 %v2382_v62, %v935_v13  ;;  %v947_v8 = vand.u32 4294901760, %v2410_v41 }
 0x194   : > { %896 = vmatpush.msra.mxu1 %v895_v27  ;;  %839 = vmatpush.msra.mxu0 %v2323_v3  ;;  %v941_v27 = vand.u32 4294901760, %v2389_v14  ;;  %v953_v53 = vand.u32 4294901760, %v2421_v38 }
 0x195   : > { %988 = vmatpush.msra.mxu2 %v2336_v47  ;;  %1035 = vmatpush.msra.mxu3 %v2323_v3 }
 0x196   : > { %902 = vmatpush.msra.mxu1 %v901_v29  ;;  %841 = vmatpush.msra.mxu0 %v2329_v50  ;;  %v925_v29 = vand.u32 4294901760, %v924_v55  ;;  %v942_v52 = vsub.f32 %v2389_v14, %v941_v27  ;;  %v948_v55 = vsub.f32 %v2410_v41, %v947_v8 }
 0x197   : > { %991 = vmatpush.msra.mxu2 %v2341_v5  ;;  %1037 = vmatpush.msra.mxu3 %v2329_v50  ;;  %v1205_v5 = vld [vmem:[#allocation3] sm:$0xff] }
 0x198   : > { %908 = vmatpush.msra.mxu1 %v907_v11  ;;  %843 = vmatpush.msra.mxu0 %v2344_v63  ;;  %v931_v11 = vand.u32 4294901760, %v930_v35  ;;  %v954_v35 = vsub.f32 %v2421_v38, %v953_v53 }
 0x199   : > { %994 = vmatpush.msra.mxu2 %v2354_v36  ;;  %1039 = vmatpush.msra.mxu3 %v2344_v63 }
 0x19a   : > { %914 = vmatpush.msra.mxu1 %v913_v6  ;;  %845 = vmatpush.msra.mxu0 %v2357_v10  ;;  %v937_v6 = vand.u32 4294901760, %v936_v30  ;;  %v955_v30 = vand.u32 4294901760, %v954_v35 }
 0x19b   : > { %997 = vmatpush.msra.mxu2 %v2371_v9  ;;  %1041 = vmatpush.msra.mxu3 %v2357_v10 }
 0x19c   : > { %920 = vmatpush.msra.mxu1 %v919_v34  ;;  %847 = vmatpush.msra.mxu0 %v2360_v37  ;;  %v943_v34 = vand.u32 4294901760, %v942_v52 }
 0x19d   : > { %1000 = vmatpush.msra.mxu2 %v2382_v62  ;;  %1043 = vmatpush.msra.mxu3 %v2360_v37 }
 0x19e   : > { %926 = vmatpush.msra.mxu1 %v925_v29  ;;  %849 = vmatpush.msra.mxu0 %v2385_v1  ;;  %v949_v29 = vand.u32 4294901760, %v948_v55 }
 0x19f   : > { %1003 = vmatpush.msra.mxu2 %v2389_v14  ;;  %1045 = vmatpush.msra.mxu3 %v2385_v1 }
 0x1a0   : > { %932 = vmatpush.msra.mxu1 %v931_v11  ;;  %851 = vmatpush.msra.mxu0 %v2399_v54 }
 0x1a1   : > { %1006 = vmatpush.msra.mxu2 %v2410_v41  ;;  %1047 = vmatpush.msra.mxu3 %v2399_v54 }
 0x1a2   : > { %1058 = vmatpush.msrb.mxu0 %v863_v45  ;;  %938 = vmatpush.msra.mxu1 %v937_v6 }
 0x1a3   : > { %1009 = vmatpush.msra.mxu2 %v2421_v38 }
 0x1a4   : > { %1062 = vmatpush.msrb.mxu0 %v869_v60  ;;  %944 = vmatpush.msra.mxu1 %v943_v34 }
 0x1a5   : > { %1194 = vmatpush.msrb.mxu2 %v1941_v26 }
 0x1a6   : > { %1066 = vmatpush.msrb.mxu0 %v875_v16  ;;  %950 = vmatpush.msra.mxu1 %v949_v29 }
 0x1a7   : > { %1195 = vmatpush.msrb.mxu2 %v1937_v24 }
 0x1a8   : > { %1070 = vmatpush.msrb.mxu0 %v881_v15  ;;  %956 = vmatpush.msra.mxu1 %v955_v30 }
 0x1a9   : > { %1196 = vmatpush.msrb.mxu2 %v1935_v23 }
 0x1aa   : > { %1125 = vmatpush.msrb.mxu1 %v2221_v32  ;;  %1074 = vmatpush.msrb.mxu0 %v887_v0 }
 0x1ab   : > { %1197 = vmatpush.msrb.mxu2 %v1933_v22 }
 0x1ac   : > { %1127 = vmatpush.msrb.mxu1 %v2224_v4  ;;  %1078 = vmatpush.msrb.mxu0 %v893_v18 }
 0x1ae   : > { %1129 = vmatpush.msrb.mxu1 %v2227_v33  ;;  %1082 = vmatpush.msrb.mxu0 %v899_v61 }
 0x1b0   : > { %1131 = vmatpush.msrb.mxu1 %v2230_v39  ;;  %1086 = vmatpush.msrb.mxu0 %v905_v57 }
 0x1b2   : > { %1133 = vmatpush.msrb.mxu1 %v2233_v40  ;;  %1090 = vmatpush.msrb.mxu0 %v911_v12 }
 0x1b4   : > { %1135 = vmatpush.msrb.mxu1 %v2236_v42  ;;  %1094 = vmatpush.msrb.mxu0 %v917_v28  ;;  %v1177_v42 = vcvt.s32.f32 %v1894_v2 }
 0x1b6   : > { %1137 = vmatpush.msrb.mxu1 %v2250_v59  ;;  %1098 = vmatpush.msrb.mxu0 %v923_v31 }
 0x1b8   : > { %1139 = vmatpush.msrb.mxu1 %v2303_v49  ;;  %1102 = vmatpush.msrb.mxu0 %v929_v7 }
 0x1ba   : > { %1141 = vmatpush.msrb.mxu1 %v2320_v44  ;;  %1106 = vmatpush.msrb.mxu0 %v935_v13 }
 0x1bc   : > { %1143 = vmatpush.msrb.mxu1 %v2323_v3  ;;  %1110 = vmatpush.msrb.mxu0 %v941_v27 }
 0x1be   : > { %1145 = vmatpush.msrb.mxu1 %v2329_v50  ;;  %1114 = vmatpush.msrb.mxu0 %v947_v8 }
 0x1c0   : > { %1147 = vmatpush.msrb.mxu1 %v2344_v63  ;;  %1118 = vmatpush.msrb.mxu0 %v953_v53  ;;  %v1209_v63 = vld [vmem:[#allocation2] sm:$0xff] }
 0x1c2   : > { %1149 = vmatpush.msrb.mxu1 %v2357_v10 }
 0x1c4   : > { %1151 = vmatpush.msrb.mxu1 %v2360_v37 }
 0x1c6   : > { %1153 = vmatpush.msrb.mxu1 %v2385_v1 }
 0x1c8   : > { %1155 = vmatpush.msrb.mxu1 %v2399_v54 }
 0x1fb   : > { %v816_v22 = vpop.xlane.xlu0 %815 }
 0x1fc   : > { %v817_v23 = vsub.f32 %v2277_v17, %v816_v22 }
 0x1fe   : > { %v818_v24 = vmul.f32 1.442695, %v817_v23 }
 0x200   : > { %1492 = vpow2.f32 %v818_v24 }
 0x206   : > { %v1493_v26 = vpop.eup %1492 }
 0x207   : > { %v852_v32 = vand.u32 4294901760, %v1493_v26 }
 0x209   : > { %958 = vmatmul.f32.vlgmr.msra.gmra.mxu1 %v852_v32  ;;  %v853_v4 = vsub.f32 %v1493_v26, %v852_v32 }
 0x20b   : > { %1012 = vmatmul.f32.vlgmr.msra.gmra.mxu2 %v853_v4  ;;  %v854_v33 = vand.u32 4294901760, %v853_v4 }
 0x20d   : > { %1051 = vmatmul.f32.vlgmr.msra.gmra.mxu3 %v854_v33  ;;  %v855_v39 = vsub.f32 %v853_v4, %v854_v33 }
 0x20f   : > { %v856_v40 = vand.u32 4294901760, %v855_v39 }
 0x211   : > { %857 = vmatmul.f32.vlgmr.msra.gmra.mxu0 %v856_v40  ;;  %1157 = vmatmul.f32.vlgmr.msrb.gmra.mxu1 %v852_v32 }
 0x213   : > { %1382 = vmatmul.msk.f32.vlgmr.msrb.gmra.mxu2 %vm1178_vm7, %v1177_v42 }
 0x219   : > { %1120 = vmatmul.f32.vlgmr.msrb.gmra.mxu0 %v852_v32 }
 0x286   : > { %v959_v51 = vpop.f32.mrf.mxu1 }
 0x28e   : > { %v858_v58 = vpop.f32.mrf.mxu0  ;;  %v1013_v56 = vpop.f32.mrf.mxu2 }
 0x28f   : > { %v960_v59 = vadd.f32 %v959_v51, %v858_v58  ;;  %v1158_v17 = vpop.f32.mrf.mxu1 }
 0x290   : > { %v1052_v21 = vpop.f32.mrf.mxu3 }
 0x291   : > { %v1014_v43 = vadd.f32 %v1013_v56, %v960_v59 }
 0x293   : > { %v1053_v20 = vadd.f32 %v1052_v21, %v1014_v43 }
 0x296   : > { %v1121_v45 = vpop.f32.mrf.mxu0  ;;  %v1199_v3 = vpop.f32.mrf.mxu2 }
 0x297   : > { %v1122_v60 = vadd.f32 %v1121_v45, %v1053_v20  ;;  %vm1203_vm12 = vcmp.eq.f32.partialorder %v1939_v25, %v1199_v3 }
 0x299   : > { %v1159_v16 = vadd.f32 %v1158_v17, %v1122_v60 }
 0x29b   : > { %v1161_v15 = vmax.f32 %v1159_v16, 1e-30 }
 0x29d   : > { %1494 = vrcp.f32 %v1161_v15  ;;  %v1173_v18 = vand.u32 2147483648, %v1161_v15  ;;  %v1171_v61 = vand.u32 2147483647, %v1161_v15  ;;  %vm1167_vm9 = vweird.f32 %v1161_v15 }
 0x29f   : > { %v1174_v44 = vor.u32 1.1754944e-38, %v1173_v18  ;;  %vm1172_vm11 = vcmp.eq.f32.partialorder %v1171_v61, 8.507059e+37 }
 0x2a3   : > { %v1495_v19 = vpop.eup %1494 }
 0x2a4   : > { %v1163_v2 = vmul.f32 %v1495_v19, %v1161_v15  ;;  %vm1168_vm8 = vweird.f32 %v1495_v19 }
 0x2a5   : > { %vm1169_vm10 = vmor %vm1167_vm9, %vm1168_vm8 }
 0x2a6   : > { %v1164_v0 = vsub.f32 1.0, %v1163_v2 }
 0x2a8   : > { %v1165_v49 = vmul.f32 %v1495_v19, %v1164_v0 }
 0x2aa   : > { %v1166_v48 = vadd.f32 %v1495_v19, %v1165_v49 }
 0x2ac   : > { %v1170_v50 = vsel %vm1169_vm10, %v1495_v19, %v1166_v48 }
 0x2ad   : > { %v1175_v57 = vsel %vm1172_vm11, %v1174_v44, %v1170_v50 }
 0x2ae   : > { %v1176_v47 = vmul.f32 %v1493_v26, %v1175_v57 }
 0x2b0   : > { %v1202_v12 = vsel %vm811_vm6, %v1176_v47, 0.0 }
 0x2b1   : > { %v1204_v36 = vsel %vm1203_vm12, %v1202_v12, 0.0  ;;  %v1207_v10 = vadd.f32 %v1205_v5, %v1202_v12 }
 0x2b2   : > { %v1211_v37 = vadd.f32 %v1209_v63, %v1204_v36 }
 0x2b3   : > { %1208 = vst [vmem:[#allocation3] sm:$0xff] %v1207_v10 }
 0x2b4   : > { %1212 = vst [vmem:[#allocation2] sm:$0xff] %v1211_v37 }
 0x2b5 PF: > { %p1383_p6 = scmp.ne.s32.totalorder %s1734_s21, 1 }
 0x2b7   : > { %1216 = sbr.rel (%p1383_p6) target bundleno = 703 (0x2bf), region = 68 }
 0x2bc   : > { %v1217_v28 = vld [vmem:[#allocation2] sm:$0xff]  ;;  %v1219_v9 = vld [vmem:[#allocation3] sm:$0xff] }
 0x2bd   : > { %1218 = vst [vmem:[#allocation12] sm:$0xff] %v1217_v28 }
 0x2be   : > { %1220 = vst [vmem:[#allocation13] sm:$0xff] %v1219_v9 }
 0x2bf PF: > { %p1429_p7 = scmp.eq.s32.totalorder %s1812_s24, 1  ;;  %s1231_s11 = sshll.u32 %s2544_s4, 4  ;;  %s1232_s11 = int_to_ptr.hbm [resolvable:$true] %s1231_s11 }
 0x2c0   : > { %s1749_s12 = smov [#allocation12]   ;;  %s1750_s21 = smov [#allocation13]  }
 0x2c1   : > { %s1229_s17 = sshll.u32 %s1749_s12, 4  ;;  %s1243_s27 = sshll.u32 %s1750_s21, 4  ;;  %s1230_s17 = int_to_ptr.vmem [resolvable:$true] %s1229_s17  ;;  %s1244_s27 = int_to_ptr.vmem [resolvable:$true] %s1243_s27 }
 0x2c2   : > { %1403 = dma.vmem_to_hbm [thread:$0]  (%p1429_p7), %s1230_s17, 128, %s1232_s11, [#allocation6]  }
 0x2c3   : > { %s1245_s6 = sshll.u32 %s2545_s5, 4  ;;  %s1246_s6 = int_to_ptr.hbm [resolvable:$true] %s1245_s6 }
 0x2c4   : > { %1405 = dma.vmem_to_hbm [thread:$0]  (%p1429_p7), %s1244_s27, 128, %s1246_s6, [#allocation14]  }
 0x2c5   : > { %1713 = dma.done.wait (%p1429_p7), [#allocation6], 128  }
 0x2c6   : > { %1715 = vsyncadd (%p1429_p7), [#allocation6], 4294967168 }
 0x2c7   : > { %1717 = dma.done.wait (%p1429_p7), [#allocation14], 128  }
 0x2c8   : > { %1719 = vsyncadd (%p1429_p7), [#allocation14], 4294967168 }
 0x2c9 PF: > { %s25_s23 = sadd.s32 1, %s1742_s23   ;;  %s2591_s7 = smov %s1857_s18 }
 0x2ca   : > { %p22_p8 = scmp.ge.s32.totalorder %s25_s23, 4   ;;  %s2592_s18 = smov %s1726_s19 }
 0x2cb   : > { %s2593_s19 = smov %s1730_s20  ;;  %s2594_s20 = smov %s2591_s7 }
 0x2cc   : > { %s2595_s21 = smov %s1738_s22  ;;  %s2596_s22 = smov %s2598_s13 }
 0x2cd   :  { %24 = sbr.rel (!%p22_p8) target bundleno = 12 (0xc), region = 120 }
 0x2d2   :  { %1264 = vsyncpa [#allocation5], 1 }
 0x2d3   :  { %1266 = vsyncpa [#allocation5 + $0x1], 1 }
 0x2d4   :  { %1267 = vsyncpa [#allocation8], 1 }
 0x2d5   :  { %1269 = vsyncpa [#allocation8 + $0x1], 1 }
 0x2d6   :  { %1270 = vsyncpa [#allocation11], 1 }
 0x2d7   :  { %1271 = vsyncpa [#allocation6], 1 }
 0x2d8   :  { %1273 = vsyncpa [#allocation6 + $0x1], 1 }
 0x2d9   :  { %1274 = vsyncpa [#allocation14], 1 }

</bundles_post_ra>
